<compile_context>
chip_gen: v7x
topology: tpu7x:2x2x1
jax: 0.10.0
libtpu: 0.0.40
codegen_flags: <defaults>
</compile_context>

<pallas_src>
import functools

import jax
import jax.numpy as jnp
from jax.experimental import pallas as pl
from jax.experimental.pallas import tpu as pltpu

LANE = 128
VMEM_LIMIT = 32 * 1024 * 1024


def _round_up(v, m):
    return (v + m - 1) // m * m


# ---------------- Kernel 1: lin1 + ReLU + partial global mean pool ----------
def _input_layer_kernel(x_ref, w_ref, b_ref, p_ref, h_ref, r_ref):
    h = jnp.dot(x_ref[...], w_ref[...], preferred_element_type=jnp.float32)
    h = jnp.maximum(h + b_ref[...], 0.0)          # F.dropout == identity (eval)
    h_ref[...] = h.astype(h_ref.dtype)
    # partial mean-pool contribution of this row tile: P[:, tile] @ h
    r_ref[0, :, :] = jnp.dot(p_ref[...], h, preferred_element_type=jnp.float32)


# ---------------- Kernel 2: one LayerNAS cell (GCNConv -> ReLU -> pool) -----
def _gcn_cell_kernel(a_ref, h_ref, w_ref, b_ref, p_ref,
                     hout_ref, r_ref, acc_ref):
    k = pl.program_id(1)

    @pl.when(k == 0)
    def _():
        acc_ref[...] = jnp.zeros_like(acc_ref)

    # A_hat[row_tile, k_tile] @ H[k_tile]   (bf16 operands, f32 accumulate)
    acc_ref[...] += jnp.dot(a_ref[...], h_ref[...],
                            preferred_element_type=jnp.float32)

    @pl.when(k == pl.num_programs(1) - 1)
    def _():
        agg = acc_ref[...].astype(jnp.bfloat16)
        hn = jnp.dot(agg, w_ref[...], preferred_element_type=jnp.float32)
        hn = jnp.maximum(hn + b_ref[...], 0.0)     # ReLU; dropout = identity
        hout_ref[...] = hn.astype(hout_ref.dtype)
        # partial global mean pool of this row tile
        r_ref[0, :, :] = jnp.dot(p_ref[...], hn,
                                 preferred_element_type=jnp.float32)


# ---------------- Kernel 3: attention-folded per-task MLP head + log_softmax
def _head_kernel(num_tasks, r_ref, w1_ref, b1_ref, w2_ref, b2_ref, out_ref):
    r = r_ref[...]                                   # [G, (cells+1)*H]
    for t in range(num_tasks):
        hm = jnp.dot(r, w1_ref[t], preferred_element_type=jnp.float32) + b1_ref[t]
        hm = jnp.maximum(hm, 0.0)
        s = jnp.dot(hm, w2_ref[t], preferred_element_type=jnp.float32) + b2_ref[t]
        m = jnp.max(s, axis=-1, keepdims=True)
        lse = m + jnp.log(jnp.sum(jnp.exp(s - m), axis=-1, keepdims=True))
        out_ref[t, :, :] = s - lse                   # lane-dense 128-wide store


# ---------------- JAX glue: graph preprocessing -----------------------------
def build_gcn_adj(edge_index, num_nodes, padded_nodes, dtype=jnp.bfloat16):
    """Dense GCN-normalized adjacency D^-1/2 (A+I) D^-1/2, edge_weight = 1.

    Matches PyG gcn_norm(add_self_loops=True): existing self-loops are dropped
    and replaced by weight-1 self-loops. Padded node rows/cols stay zero.
    """
    # TODO(synk): for large sparse graphs replace this dense A_hat with a CSR
    #             scalar-prefetch gather kernel (PrefetchScalarGridSpec).
    src, dst = edge_index[0], edge_index[1]
    w = jnp.where(src == dst, 0.0, 1.0).astype(jnp.float32)
    A = jnp.zeros((padded_nodes, padded_nodes), jnp.float32).at[dst, src].add(w)
    diag = (jnp.arange(padded_nodes) < num_nodes).astype(jnp.float32)
    A = A + jnp.diag(diag)
    deg = A.sum(axis=1)
    dinv = jnp.where(deg > 0.0, jax.lax.rsqrt(deg), 0.0)
    return (dinv[:, None] * A * dinv[None, :]).astype(dtype)


def build_mean_pool(batch, num_graphs, padded_nodes):
    n = batch.shape[0]
    bp = jnp.full((padded_nodes,), -1, jnp.int32).at[:n].set(batch.astype(jnp.int32))
    onehot = (bp[None, :] ==
              jnp.arange(num_graphs, dtype=jnp.int32)[:, None]).astype(jnp.float32)
    counts = jnp.maximum(onehot.sum(axis=1, keepdims=True), 1.0)
    return onehot / counts


# ---------------- Forward wrapper -------------------------------------------
def gnn_forward(params, x, edge_index, batch, *, num_graphs, tile_n=128):
    f32, bf16 = jnp.float32, jnp.bfloat16
    N, F = x.shape
    HD = params["w1"].shape[1]
    cells = params["wc"].shape[0]
    T = params["wt1"].shape[0]
    NC = params["wt2"].shape[-1]
    C1 = cells + 1
    G = num_graphs
    assert tile_n % LANE == 0
    # TODO(synk): if hidden_dim is not a multiple of 128, zero-pad W/b/hidden
    #             the same way features/classes are padded below.
    assert HD % LANE == 0, "pick hidden_dim as a multiple of 128 (lane-dense)"

    NP = _round_up(max(N, tile_n), tile_n)       # padded node count
    FP = _round_up(F, LANE)                      # padded feature count
    CP = _round_up(NC, LANE)                     # padded class count
    RT = NP // tile_n
    KT = NP // tile_n

    # graph preprocessing (dense normalized adjacency + mean-pool matrix)
    a_hat = build_gcn_adj(edge_index, N, NP, dtype=bf16)     # [NP, NP] bf16
    pool = build_mean_pool(batch, G, NP)                     # [G, NP]  f32

    # pad / cast operands (bf16 storage, f32 accumulation in the kernels)
    xp = jnp.zeros((NP, FP), bf16).at[:N, :F].set(x.astype(bf16))
    w1p = jnp.zeros((FP, HD), bf16).at[:F, :].set(params["w1"].astype(bf16))
    b1 = params["b1"].reshape(1, HD).astype(f32)
    wc = params["wc"].astype(bf16)                           # [cells, HD, HD]
    bc = params["bc"].reshape(cells, 1, HD).astype(f32)

    # --- layer 0: H0 = relu(x @ W1 + b1); repr0 = mean-pool(H0) -------------
    h, r0p = pl.pallas_call(
        _input_layer_kernel,
        out_shape=(jax.ShapeDtypeStruct((NP, HD), bf16),
                   jax.ShapeDtypeStruct((RT, G, HD), f32)),
        grid_spec=pltpu.PrefetchScalarGridSpec(
            num_scalar_prefetch=0,
            grid=(RT,),
            in_specs=[pl.BlockSpec((tile_n, FP), lambda i: (i, 0)),
                      pl.BlockSpec((FP, HD), lambda i: (0, 0)),
                      pl.BlockSpec((1, HD), lambda i: (0, 0)),
                      pl.BlockSpec((G, tile_n), lambda i: (0, i))],
            out_specs=[pl.BlockSpec((tile_n, HD), lambda i: (i, 0)),
                       pl.BlockSpec((1, G, HD), lambda i: (i, 0, 0))]),
        compiler_params=pltpu.CompilerParams(
            dimension_semantics=("parallel",),
            vmem_limit_bytes=VMEM_LIMIT),
    )(xp, w1p, b1, pool)
    reprs = [jnp.sum(r0p, axis=0)]

    # --- GCN cells: tiled, pipelined A_hat @ H @ W + b, fused pooling -------
    cell_cp = pltpu.CompilerParams(
        dimension_semantics=("parallel", "arbitrary"),
        vmem_limit_bytes=VMEM_LIMIT)
    for c in range(cells):
        h, rcp = pl.pallas_call(
            _gcn_cell_kernel,
            out_shape=(jax.ShapeDtypeStruct((NP, HD), bf16),
                       jax.ShapeDtypeStruct((RT, G, HD), f32)),
            grid_spec=pltpu.PrefetchScalarGridSpec(
                num_scalar_prefetch=0,
                grid=(RT, KT),
                in_specs=[pl.BlockSpec((tile_n, tile_n), lambda i, k: (i, k)),
                          pl.BlockSpec((tile_n, HD), lambda i, k: (k, 0)),
                          pl.BlockSpec((HD, HD), lambda i, k: (0, 0)),
                          pl.BlockSpec((1, HD), lambda i, k: (0, 0)),
                          pl.BlockSpec((G, tile_n), lambda i, k: (0, i))],
                out_specs=[pl.BlockSpec((tile_n, HD), lambda i, k: (i, 0)),
                           pl.BlockSpec((1, G, HD), lambda i, k: (i, 0, 0))],
                scratch_shapes=[pltpu.VMEM((tile_n, HD), f32)]),
            compiler_params=cell_cp,
        )(a_hat, h, wc[c], bc[c], pool)
        reprs.append(jnp.sum(rcp, axis=0))

    # --- Post_Process ('att_mlp') head, all tasks, lane-dense ---------------
    r_rows = jnp.concatenate(reprs, axis=1)                  # [G, C1*HD]
    att = params["att"].astype(f32)                          # [T, C1]
    wt1 = params["wt1"].astype(f32)                          # [T, HD, HD]
    # fold attention into the first head matmul:
    #   (sum_c att[t,c]*repr_c) @ W1_t == concat_c(repr_c) @ concat_c(att[t,c]*W1_t)
    w1e = (att[:, :, None, None] * wt1[:, None, :, :]).reshape(T, C1 * HD, HD)
    bt1 = params["bt1"].reshape(T, 1, HD).astype(f32)
    wt2p = jnp.zeros((T, HD, CP), f32).at[:, :, :NC].set(params["wt2"].astype(f32))
    bt2p = jnp.full((T, 1, CP), -1e30, f32).at[:, :, :NC].set(
        params["bt2"].reshape(T, 1, NC).astype(f32))

    vmem = pl.BlockSpec(memory_space=pltpu.MemorySpace.VMEM)
    out_tgc = pl.pallas_call(
        functools.partial(_head_kernel, T),
        out_shape=jax.ShapeDtypeStruct((T, G, CP), f32),
        in_specs=[vmem] * 5,
        out_specs=vmem,
        compiler_params=pltpu.CompilerParams(vmem_limit_bytes=VMEM_LIMIT),
    )(r_rows, w1e, bt1, wt2p, bt2p)

    # torch.stack(pred_tasks, dim=-1) -> [num_graphs, num_classes, num_tasks]
    return jnp.transpose(out_tgc[:, :, :NC], (1, 2, 0))


# ---------------- Deterministic parameter init ------------------------------
def init_params(key, in_features, hidden_dim, num_classes, cells_num, num_tasks):
    ks = jax.random.split(key, 5)

    def glorot(k, shape):
        fan_in, fan_out = shape[-2], shape[-1]
        lim = (6.0 / (fan_in + fan_out)) ** 0.5
        return jax.random.uniform(k, shape, jnp.float32, -lim, lim)

    return dict(
        w1=glorot(ks[0], (in_features, hidden_dim)),
        b1=jnp.zeros((1, hidden_dim), jnp.float32),
        wc=glorot(ks[1], (cells_num, hidden_dim, hidden_dim)),
        bc=jnp.zeros((cells_num, 1, hidden_dim), jnp.float32),
        att=glorot(ks[2], (num_tasks, cells_num + 1)),
        wt1=glorot(ks[3], (num_tasks, hidden_dim, hidden_dim)),
        bt1=jnp.zeros((num_tasks, 1, hidden_dim), jnp.float32),
        wt2=glorot(ks[4], (num_tasks, hidden_dim, num_classes)),
        bt2=jnp.zeros((num_tasks, 1, num_classes), jnp.float32),
    )


if __name__ == "__main__":
    # small shapes; hidden_dim = 128 (lane/MXU-friendly), N padded to 384 so
    # the cell kernels run a real (3, 3) grid with 128x128 A_hat tiles.
    N, F, HIDDEN, NUM_CLASSES = 300, 8, 128, 4
    CELLS, TASKS, GRAPHS, E = 2, 2, 2, 600

    key = jax.random.PRNGKey(0)
    kx, ke1, ke2, kp = jax.random.split(key, 4)

    x = jax.random.normal(kx, (N, F), jnp.float32)
    half = N // 2
    batch = jnp.concatenate([jnp.zeros(half, jnp.int32),
                             jnp.ones(N - half, jnp.int32)])
    # two graphs: intra-graph random edges only
    src0 = jax.random.randint(ke1, (E // 2,), 0, half)
    dst0 = jax.random.randint(ke2, (E // 2,), 0, half)
    edge_index = jnp.stack([
        jnp.concatenate([src0, src0 + half]),
        jnp.concatenate([dst0, dst0 + half]),
    ])

    params = init_params(kp, F, HIDDEN, NUM_CLASSES, CELLS, TASKS)

    out = gnn_forward(params, x, edge_index, batch,
                      num_graphs=GRAPHS, tile_n=128)
    jax.block_until_ready(out)
    assert out.shape == (GRAPHS, NUM_CLASSES, TASKS), out.shape
    assert bool(jnp.all(jnp.isfinite(out)))
    print("KERNEL_OK")
</pallas_src>

<mosaic_0001>
module attributes {stable_mosaic.version = 11 : i64} {
  func.func @_input_layer_kernel(%arg0: i32, %arg1: memref<128x128xbf16, #tpu.memory_space<vmem>>, %arg2: memref<128x128xbf16, #tpu.memory_space<vmem>>, %arg3: memref<1x128xf32, #tpu.memory_space<vmem>>, %arg4: memref<2x128xf32, #tpu.memory_space<vmem>>, %arg5: memref<128x128xbf16, #tpu.memory_space<vmem>>, %arg6: memref<1x2x128xf32, #tpu.memory_space<vmem>>) attributes {dimension_semantics = [#tpu.dimension_semantics<parallel>], iteration_bounds = array<i64: 3>, scalar_prefetch = 0 : i64, scratch_operands = 0 : i64, tpu.core_type = #tpu.core_type<tc>, window_params = [{transform_indices = @transform_0, window_bounds = array<i64: 128, 128>}, {pipeline_mode = #tpu.pipeline_mode<synchronous>, transform_indices = @transform_1, window_bounds = array<i64: 128, 128>}, {pipeline_mode = #tpu.pipeline_mode<synchronous>, transform_indices = @transform_2, window_bounds = array<i64: 1, 128>}, {transform_indices = @transform_3, window_bounds = array<i64: 2, 128>}, {transform_indices = @transform_4, window_bounds = array<i64: 128, 128>}, {transform_indices = @transform_5, window_bounds = array<i64: 1, 2, 128>}]} {
    %c0 = arith.constant 0 : index
    %c0_0 = arith.constant 0 : index
    %0 = vector.load %arg1[%c0, %c0_0] : memref<128x128xbf16, #tpu.memory_space<vmem>>, vector<128x128xbf16>
    %c0_1 = arith.constant 0 : index
    %c0_2 = arith.constant 0 : index
    %1 = vector.load %arg2[%c0_1, %c0_2] : memref<128x128xbf16, #tpu.memory_space<vmem>>, vector<128x128xbf16>
    %cst = arith.constant dense<0.000000e+00> : vector<128x128xf32>
    %2 = tpu.matmul %0, %1, %cst {dimension_numbers = #tpu.dot_dimension_numbers<[1], [0], [0], [1], [0, 0, 1, 1], [], []>} : vector<128x128xbf16>, vector<128x128xbf16>, vector<128x128xf32> -> vector<128x128xf32>
    %c0_3 = arith.constant 0 : index
    %c0_4 = arith.constant 0 : index
    %3 = vector.load %arg3[%c0_3, %c0_4] : memref<1x128xf32, #tpu.memory_space<vmem>>, vector<1x128xf32>
    %4 = vector.broadcast %3 : vector<1x128xf32> to vector<128x128xf32>
    %5 = arith.addf %2, %4 : vector<128x128xf32>
    %cst_5 = arith.constant 0.000000e+00 : f32
    %6 = vector.broadcast %cst_5 : f32 to vector<128x128xf32>
    %7 = arith.maximumf %5, %6 : vector<128x128xf32>
    %8 = arith.truncf %7 : vector<128x128xf32> to vector<128x128xbf16>
    %c0_6 = arith.constant 0 : index
    %c0_7 = arith.constant 0 : index
    %9 = vector.load %arg5[%c0_6, %c0_7] : memref<128x128xbf16, #tpu.memory_space<vmem>>, vector<128x128xbf16>
    tpu.vector_store %arg5[%c0_6, %c0_7], %8 {strides = array<i32>} : memref<128x128xbf16, #tpu.memory_space<vmem>>, vector<128x128xbf16>,
    %c0_8 = arith.constant 0 : index
    %c0_9 = arith.constant 0 : index
    %10 = vector.load %arg4[%c0_8, %c0_9] : memref<2x128xf32, #tpu.memory_space<vmem>>, vector<2x128xf32>
    %cst_10 = arith.constant dense<0.000000e+00> : vector<2x128xf32>
    %11 = tpu.matmul %10, %7, %cst_10 {dimension_numbers = #tpu.dot_dimension_numbers<[1], [0], [0], [1], [0, 0, 1, 1], [], []>} : vector<2x128xf32>, vector<128x128xf32>, vector<2x128xf32> -> vector<2x128xf32>
    %c0_11 = arith.constant 0 : index
    %c0_12 = arith.constant 0 : index
    %c0_13 = arith.constant 0 : index
    %12 = vector.load %arg6[%c0_11, %c0_12, %c0_13] : memref<1x2x128xf32, #tpu.memory_space<vmem>>, vector<1x2x128xf32>
    %13 = vector.shape_cast %12 : vector<1x2x128xf32> to vector<2x128xf32>
    %14 = vector.shape_cast %11 : vector<2x128xf32> to vector<1x2x128xf32>
    tpu.vector_store %arg6[%c0_11, %c0_12, %c0_13], %14 {strides = array<i32>} : memref<1x2x128xf32, #tpu.memory_space<vmem>>, vector<1x2x128xf32>,
    return
  }
  func.func @transform_0(%arg0: i32) -> (i32, i32) {
    %c0_i32 = arith.constant 0 : i32
    %c0_i32_0 = arith.constant 0 : i32
    return %arg0, %c0_i32 : i32, i32
  }
  func.func @transform_1(%arg0: i32) -> (i32, i32) {
    %c0_i32 = arith.constant 0 : i32
    %c0_i32_0 = arith.constant 0 : i32
    %c0_i32_1 = arith.constant 0 : i32
    return %c0_i32, %c0_i32_0 : i32, i32
  }
  func.func @transform_2(%arg0: i32) -> (i32, i32) {
    %c0_i32 = arith.constant 0 : i32
    %c0_i32_0 = arith.constant 0 : i32
    %c0_i32_1 = arith.constant 0 : i32
    return %c0_i32, %c0_i32_0 : i32, i32
  }
  func.func @transform_3(%arg0: i32) -> (i32, i32) {
    %c0_i32 = arith.constant 0 : i32
    %c0_i32_0 = arith.constant 0 : i32
    return %c0_i32, %arg0 : i32, i32
  }
  func.func @transform_4(%arg0: i32) -> (i32, i32) {
    %c0_i32 = arith.constant 0 : i32
    %c0_i32_0 = arith.constant 0 : i32
    return %arg0, %c0_i32 : i32, i32
  }
  func.func @transform_5(%arg0: i32) -> (i32, i32, i32) {
    %c0_i32 = arith.constant 0 : i32
    %c0_i32_0 = arith.constant 0 : i32
    %c0_i32_1 = arith.constant 0 : i32
    return %arg0, %c0_i32, %c0_i32_0 : i32, i32, i32
  }
}

</mosaic_0001>

<bundles_post_ra>
// kernel: tpu_custom_call.1
= control target key start
LH: loop header
LB: loop body
LE: loop exit
PB: predicated region body
PF: predicated region fallthrough
CT: control target
= control target key end

     0   :  { %11 = vsyncpa [#allocation3], 0  ;;  %s1666_s0 = inlined_call_operand.hbm [shape: bf16[384,128], index: 0, kind: input, shape index: {}]   ;;  %s1667_s1 = inlined_call_operand.hbm [shape: bf16[128,128], index: 1, kind: input, shape index: {}]   ;;  %s1668_s2 = inlined_call_operand.vmem [shape: f32[1,128], index: 2, kind: input, shape index: {}]   ;;  %s1669_s3 = inlined_call_operand.vmem [shape: f32[2,384], index: 3, kind: input, shape index: {}]   ;;  %s1670_s4 = inlined_call_operand.hbm [shape: bf16[384,128], index: 4, kind: output, shape index: {0}]   ;;  %s1671_s5 = inlined_call_operand.hbm [shape: f32[3,2,128], index: 5, kind: output, shape index: {1}]  }
   0x1   :  { %13 = vsyncpa [#allocation3 + $0x1], 0 }
   0x2   :  { %14 = vsyncpa [#allocation6], 0 }
   0x3   :  { %15 = vsyncpa [#allocation4], 0 }
   0x4   :  { %17 = vsyncpa [#allocation4 + $0x1], 0 }
   0x5   :  { %18 = vsyncpa [#allocation9], 0 }
   0x6   :  { %20 = vsyncpa [#allocation9 + $0x1], 0  ;;  %s1378_s18 = smov 0   ;;  %s1380_s19 = smov 0  }
   0x7   :  { %s1382_s20 = smov 0   ;;  %s1384_s21 = smov 0  }
   0x8 LB: > { %s1399_s22 = sadd.s32 4294967295, %s1335_s21   ;;  %s848_s23 = sadd.s32 4294967294, %s1335_s21   ;;  %s1335_s21 = sphi %s1384_s21, %s1690_s21   ;;  %s1331_s20 = sphi %s1382_s20, %s1689_s20   ;;  %s1327_s19 = sphi %s1380_s19, %s1688_s19   ;;  %s1323_s18 = sphi %s1378_s18, %s1687_s18  }
   0x9   : > { %p46_p0 = scmp.ne.s32.totalorder %s1327_s19, %s1323_s18  ;;  %p1672_p1 = scmp.eq.s32.totalorder %s1399_s22, 0 }
   0xa   : > { %p144_p3 = scmp.eq.s32.totalorder %s848_s23, 2  ;;  %p849_p5 = scmp.ge.s32.totalorder %s1335_s21, 1 }
   0xb   : > { %p1408_p4 = por %p1672_p1, %p46_p0  ;;  %p177_p7 = scmp.lt.s32.totalorder %s1335_s21, 4 }
   0xc   : > { %p1413_p6 = por %p144_p3, %p46_p0  ;;  %s1337_s27 = smov [#allocation5]  }
   0xd   : > { %s1675_s24 = scalar_select %p1408_p4, 1, 0 }
   0xe   : > { %s1676_s25 = scalar_select %p1413_p6, 1, 0 }
   0xf   : > { %p1418_p8 = pnand %p849_p5, %p177_p7  ;;  %s189_s28 = sshll.u32 %s1337_s27, 4  ;;  %s190_s28 = int_to_ptr.vmem [resolvable:$true] %s189_s28 }
  0x10   : > { %s1431_s30 = sadd.s32 1, %s1335_s21   ;;  %s33_s6 = sadd.s32 1, %s1331_s20 }
  0x11   : > { %s1677_s26 = scalar_select %p1418_p8, 1, 0 }
  0x12   : > { %p1100_p9 = pneg %p1418_p8  ;;  %s30_s7 = ssub.s32 %s1335_s21, %s1431_s30 }
  0x13   : > { %s1175_s10 = scalar_lea.hbm %s1667_s1, 1024 }
  0x14   : > { %p1426_p10 = pnand %p1100_p9, %p1672_p1  ;;  %p1176_p11 = scmp.ne.s32.totalorder %s1667_s1, %s1175_s10 }
  0x15   : > { %p1182_p3 = scmp.lt.u32.totalorder %s1175_s10, %s1667_s1 }
  0x16   : > { %p1177_p12 = pneg %p1426_p10 }
  0x18   : > { %p1178_p13 = pnand %p1177_p12, %p1176_p11 }
  0x1a   : > { %p1179_p0 = pneg %p1178_p13 }
  0x1c   : > { %p1184_p5 = pnand %p1182_p3, %p1179_p0 }
  0x1e   : > { %1187 = shalt.err (!%p1184_p5)
}
  0x1f   : > { %s1188_s15 = scalar_lea.vmem %s190_s28, 1024  ;;  %p1196_p2 = scmp.lt.s32.totalorder %s190_s28, %s190_s28 }
  0x20   : > { %p1189_p7 = scmp.ne.s32.totalorder %s190_s28, %s1188_s15  ;;  %p1197_p6 = scmp.lt.s32.totalorder %s1188_s15, %s1188_s15 }
  0x22   : > { %p1191_p9 = pnand %p1189_p7, %p1177_p12  ;;  %p1198_p4 = por %p1197_p6, %p1196_p2 }
  0x24   : > { %p1192_p1 = pneg %p1191_p9 }
  0x26   : > { %p1199_p8 = pnand %p1198_p4, %p1192_p1 }
  0x28   : > { %1202 = shalt.err (!%p1199_p8)
}
  0x29   : > { %s1338_s16 = smov 64   ;;  %s1339_s17 = smov 4  }
  0x2a   : > { %1103 = dma.hbm_to_vmem [thread:$0]  (!%p1426_p10), %s1667_s1, 1024, %s190_s28, [#allocation6], %s1338_s16, %s1338_s16, %s1339_s17  }
  0x2b   : > { %p31_p1 = scmp.eq.s32.totalorder %s30_s7, 0  ;;  %p40_p2 = scmp.ne.s32.totalorder %s1331_s20, %s1327_s19 }
  0x2c   : > { %p41_p4 = scmp.eq.s32.totalorder %s1335_s21, 0  ;;  %p1116_p6 = scmp.lt.s32.totalorder %s1335_s21, 3 }
  0x2d   : > { %s1460_s8 = scalar_select %p31_p1, %s1331_s20, %s33_s6  }
  0x2e   : > { %p42_p8 = por %p41_p4, %p40_p2  ;;  %p1679_p11 = scmp.eq.s32.totalorder %s1399_s22, 2 }
  0x2f   : > { %s206_s29 = sand.u32 1, %s1331_s20   ;;  %s901_s10 = sshll.u32 %s1335_s21, 10 }
  0x30   : > { %p1464_p12 = por %p1679_p11, %p40_p2  ;;  %s852_s11 = sshll.u32 %s206_s29, 6 }
  0x31   : > { %s1473_s14 = scalar_lea.hbm %s1666_s0, %s901_s10  ;;  %s210_s28 = scalar_lea.vmem [#allocation2], %s852_s11 }
  0x32   : > { %s217_s6 = sshll.u32 %s210_s28, 4  ;;  %p1475_p10 = pnand %p1116_p6, %p42_p8  ;;  %s1479_s6 = int_to_ptr.vmem [resolvable:$true] %s217_s6 }
  0x33   : > { %s1481_s15 = scalar_lea.sflag [#allocation3], %s206_s29  ;;  %s1203_s23 = scalar_lea.hbm %s1473_s14, 1024 }
  0x34   : > { %p1204_p13 = scmp.ne.s32.totalorder %s1473_s14, %s1203_s23  ;;  %p1205_p0 = pneg %p1475_p10 }
  0x35   : > { %s1208_s11 = scalar_lea.hbm %s1666_s0, 3072  ;;  %p1209_p7 = scmp.lt.u32.totalorder %s1473_s14, %s1666_s0 }
  0x36   : > { %p1206_p3 = pnand %p1205_p0, %p1204_p13  ;;  %p1210_p9 = scmp.lt.u32.totalorder %s1208_s11, %s1203_s23 }
  0x37   : > { %p1212_p2 = scmp.lt.u32.totalorder %s1203_s23, %s1473_s14 }
  0x38   : > { %p1207_p5 = pneg %p1206_p3  ;;  %p1211_p1 = por %p1210_p9, %p1209_p7 }
  0x3a   : > { %p1213_p4 = por %p1212_p2, %p1211_p1 }
  0x3c   : > { %p1214_p6 = pnand %p1213_p4, %p1207_p5 }
  0x3e   : > { %1217 = shalt.err (!%p1214_p6)
}
  0x3f   : > { %s1218_s29 = scalar_lea.vmem %s1479_s6, 1024  ;;  %s1340_s28 = smov [#allocation2]  }
  0x40   : > { %p1219_p8 = scmp.ne.s32.totalorder %s1479_s6, %s1218_s29  ;;  %s1223_s27 = sshll.u32 %s1340_s28, 4  ;;  %s1224_s27 = int_to_ptr.vmem [resolvable:$false] %s1223_s27 }
  0x41   : > { %s1225_s10 = scalar_lea.vmem %s1224_s27, 2048  ;;  %p1226_p3 = scmp.lt.s32.totalorder %s1479_s6, %s1224_s27 }
  0x42   : > { %p1221_p11 = pnand %p1219_p8, %p1205_p0  ;;  %p1227_p7 = scmp.lt.s32.totalorder %s1225_s10, %s1218_s29 }
  0x44   : > { %p1222_p13 = pneg %p1221_p11  ;;  %p1228_p9 = por %p1227_p7, %p1226_p3 }
  0x46   : > { %p1229_p1 = pnand %p1228_p9, %p1222_p13 }
  0x48   : > { %1232 = shalt.err (!%p1229_p1)
}
  0x49   : > { %1107 = dma.hbm_to_vmem [thread:$0]  (!%p1475_p10), %s1473_s14, 1024, %s1479_s6, %s1481_s15, %s1338_s16, %s1338_s16, %s1339_s17  }
  0x4a   : > { %p1682_p0 = scmp.ne.s32.totalorder %s1677_s26, 0 }
  0x4b   : > { %s1515_s23 = sand.u32 (!%p1682_p0), 1, %s1327_s19   ;;  %p1683_p5 = scmp.ne.s32.totalorder (!%p1682_p0), %s1675_s24, 0 }
  0x4c   : > { %236 = sbr.rel (%p1682_p0) target bundleno = 598 (0x256), region = 36  ;;  %s856_s11 = sshll.u32 (!%p1682_p0), %s1515_s23, 6 }
  0x4d   : > { %s239_s12 = scalar_lea.sflag (!%p1682_p0), [#allocation3], %s1515_s23  ;;  %s1521_s7 = scalar_lea.vmem (!%p1682_p0), [#allocation2], %s856_s11 }
  0x53   : > { %1306 = dma.done.wait (%p1683_p5), %s239_s12, 1024  }
  0x54   : > { %1308 = vsyncadd (%p1683_p5), %s239_s12, 4294966272  ;;  %p1684_p10 = scmp.eq.s32.totalorder %s1399_s22, 0 }
  0x56   : > { %1310 = dma.done.wait (%p1684_p10), [#allocation6], 1024   ;;  %p1685_p2 = pmov %p1684_p10 }
  0x57   : > { %v1159_v0 = vld [vmem:[#allocation5] sm:$0xff]   ;;  %v1160_v1 = vld [vmem:[#allocation5 + $0x8] sm:$0xff]   ;;  %v1161_v2 = vld [vmem:[#allocation5 + $0x10] sm:$0xff]   ;;  %v1341_v16 = vmov 0.0|0.0   ;;  %vm1342_vm0 = vmmov 0   ;;  %v1343_v17 = vmov 0.0  }
  0x58   : > { %1312 = vsyncadd (%p1685_p2), [#allocation6], 4294966272  ;;  %999 = vmatprep.subr.bf16.mxu0 %v1159_v0  ;;  %v1162_v3 = vld [vmem:[#allocation5 + $0x18] sm:$0xff]   ;;  %v1167_v4 = vld [vmem:[%s1521_s7] sm:$0xff]   ;;  %1066 = vmatprep.subr.bf16.mxu1 %v1341_v16  ;;  %s1551_s16 = scalar_lea.vmem [#allocation7], %s856_s11  ;;  %p283_p4 = scmp.lt.s32.totalorder %s1399_s22, 2 }
  0x59   : > { %1000 = vmatpush3.bf16.msra.mxu0 %v1159_v0  ;;  %1015 = vmatprep.mubr.bf16.mxu0 %v1167_v4  ;;  %v1163_v5 = vld [vmem:[#allocation5 + $0x20] sm:$0xff]   ;;  %v1164_v6 = vld [vmem:[#allocation5 + $0x28] sm:$0xff]   ;;  %v1165_v7 = vld [vmem:[#allocation5 + $0x30] sm:$0xff]   ;;  %s708_s29 = sshll.u32 %s1551_s16, 4  ;;  %s918_s28 = sshll.u32 %s1399_s22, 10  ;;  %s1587_s29 = int_to_ptr.vmem [resolvable:$true] %s708_s29 }
  0x5a   : > { %1001 = vmatprep.subr.bf16.mxu0 %v1160_v1  ;;  %v1166_v8 = vld [vmem:[#allocation5 + $0x38] sm:$0xff]   ;;  %v1168_v9 = vld [vmem:[%s1521_s7 + $0x8] sm:$0xff]   ;;  %v1169_v10 = vld [vmem:[%s1521_s7 + $0x10] sm:$0xff]   ;;  %1063 = vmatprep.mubr.msk.f32.mxu1 %vm1342_vm0, %v1343_v17  ;;  %s284_s17 = scalar_select %p283_p4, %s1399_s22, 2 }
  0x5b   : > { %v1170_v11 = vld [vmem:[%s1521_s7 + $0x18] sm:$0xff]   ;;  %v1171_v12 = vld [vmem:[%s1521_s7 + $0x20] sm:$0xff]   ;;  %v1172_v13 = vld [vmem:[%s1521_s7 + $0x28] sm:$0xff]   ;;  %s1592_s11 = scalar_lea.hbm %s1670_s4, %s918_s28  ;;  %s690_s12 = scalar_lea.sflag [#allocation4], %s1515_s23 }
  0x5c   : > { %v1173_v14 = vld [vmem:[%s1521_s7 + $0x30] sm:$0xff]   ;;  %v1174_v15 = vld [vmem:[%s1521_s7 + $0x38] sm:$0xff]   ;;  %v1543_v18 = vld [vmem:[%s1668_s2] ss:$0 sm:$0xff]  ;;  %s860_s14 = sshll.u32 %s284_s17, 1  ;;  %s1233_s7 = scalar_lea.vmem %s1587_s29, 1024 }
  0x5d   : > { %1002 = vmatpush3.bf16.msra.mxu0 %v1160_v1  ;;  %s286_s13 = scalar_lea.vmem %s1669_s3, %s860_s14  ;;  %p1234_p6 = scmp.ne.s32.totalorder %s1587_s29, %s1233_s7 }
  0x5e   : > { %1003 = vmatprep.subr.bf16.mxu0 %v1161_v2  ;;  %s1344_s24 = smov [#allocation7]  }
  0x5f   : > { %p1235_p8 = pnand %p1234_p6, %p1464_p12  ;;  %s1237_s26 = sshll.u32 %s1344_s24, 4  ;;  %s1238_s26 = int_to_ptr.vmem [resolvable:$false] %s1237_s26 }
  0x60   : > { %p1240_p13 = scmp.lt.s32.totalorder %s1587_s29, %s1238_s26 }
  0x61   : > { %1004 = vmatpush3.bf16.msra.mxu0 %v1161_v2  ;;  %p1236_p11 = pneg %p1235_p8 }
  0x62   : > { %1005 = vmatprep.subr.bf16.mxu0 %v1162_v3 }
  0x65   : > { %1006 = vmatpush3.bf16.msra.mxu0 %v1162_v3 }
  0x66   : > { %1007 = vmatprep.subr.bf16.mxu0 %v1163_v5 }
  0x69   : > { %1008 = vmatpush3.bf16.msra.mxu0 %v1163_v5 }
  0x6a   : > { %1009 = vmatprep.subr.bf16.mxu0 %v1164_v6 }
  0x6d   : > { %1010 = vmatpush3.bf16.msra.mxu0 %v1164_v6 }
  0x6e   : > { %1011 = vmatprep.subr.bf16.mxu0 %v1165_v7 }
  0x71   : > { %1012 = vmatpush3.bf16.msra.mxu0 %v1165_v7 }
  0x72   : > { %1013 = vmatprep.subr.bf16.mxu0 %v1166_v8 }
  0x75   : > { %1014 = vmatpush3.bf16.msra.mxu0 %v1166_v8 }
  0x78   : > { %1016 = vmatmul.mubr.bf16.vlgmr.msra.gmra.mrb[0].mxu0 %v1168_v9 }
  0x79   : > { %1019 = vmatprep.mubr.bf16.mxu0 %v1169_v10 }
  0x80   : > { %1020 = vmatmul.mubr.bf16.gmra.mrb[4].mxu0 %v1170_v11  ;;  %v617_v11 = vld [vmem:[%s286_s13] sm:$0x3] }
  0x81   : > { %1023 = vmatprep.mubr.bf16.mxu0 %v1171_v12 }
  0x88   : > { %1024 = vmatmul.mubr.bf16.gmra.mrb[8].mxu0 %v1172_v13 }
  0x89   : > { %1027 = vmatprep.mubr.bf16.mxu0 %v1173_v14 }
  0x90   : > { %1028 = vmatmul.mubr.bf16.gmra.mrb[12].mxu0 %v1174_v15 }
 0x14b   : > { %v1017_v19 = vpop.f32.mrb[0].mxu0 }
 0x14c   : > { %v467_v20 = vadd.f32 %v1017_v19, %v1543_v18  ;;  %v458_v21 = vpop.f32.mrb[1].mxu0 }
 0x14d   : > { %v459_v22 = vadd.f32 %v1543_v18, %v458_v21  ;;  %v1018_v23 = vpop.f32.mrb[2].mxu0 }
 0x14e   : > { %v470_v24 = vadd.f32 %v1018_v23, %v1543_v18  ;;  %v461_v25 = vpop.f32.mrb[3].mxu0  ;;  %v523_v27 = vmax.f32 %v467_v20, 0.0 }
 0x14f   : > { %v462_v26 = vadd.f32 %v1543_v18, %v461_v25  ;;  %v521_v29 = vmax.f32 %v459_v22, 0.0 }
 0x150   : > { %v524_v28 = vmax.f32 %v470_v24, 0.0 }
 0x151   : > { %v522_v30 = vmax.f32 %v462_v26, 0.0 }
 0x152   : > { %v927_v31 = vpack.c.bf16 %v524_v28, %v523_v27 }
 0x153   : > { %v1021_v32 = vpop.f32.mrb[4].mxu0  ;;  %v922_v33 = vpack.c.bf16 %v522_v30, %v521_v29 }
 0x154   : > { %959 = vst [vmem:[%s1551_s16 + $0x8] sm:$0xff] %v927_v31   ;;  %v483_v34 = vadd.f32 %v1021_v32, %v1543_v18  ;;  %v474_v35 = vpop.f32.mrb[5].mxu0 }
 0x155   : > { %v475_v36 = vadd.f32 %v1543_v18, %v474_v35  ;;  %v1022_v37 = vpop.f32.mrb[6].mxu0  ;;  %923 = vst [vmem:[%s1551_s16] sm:$0xff] %v922_v33   ;;  %1068 = vmatpush3.bf16.msra.mxu1 %v922_v33 }
 0x156   : > { %v486_v38 = vadd.f32 %v1022_v37, %v1543_v18  ;;  %v477_v39 = vpop.f32.mrb[7].mxu0  ;;  %1069 = vmatprep.subr.bf16.mxu1 %v1341_v16  ;;  %v527_v41 = vmax.f32 %v483_v34, 0.0 }
 0x157   : > { %v478_v40 = vadd.f32 %v1543_v18, %v477_v39  ;;  %v525_v43 = vmax.f32 %v475_v36, 0.0 }
 0x158   : > { %v528_v42 = vmax.f32 %v486_v38, 0.0 }
 0x159   : > { %v526_v44 = vmax.f32 %v478_v40, 0.0  ;;  %1071 = vmatpush3.bf16.msra.mxu1 %v927_v31 }
 0x15a   : > { %v937_v45 = vpack.c.bf16 %v528_v42, %v527_v41  ;;  %1072 = vmatprep.subr.bf16.mxu1 %v1341_v16 }
 0x15b   : > { %v932_v46 = vpack.c.bf16 %v526_v44, %v525_v43  ;;  %v1025_v47 = vpop.f32.mrb[8].mxu0 }
 0x15c   : > { %961 = vst [vmem:[%s1551_s16 + $0x18] sm:$0xff] %v937_v45   ;;  %v499_v48 = vadd.f32 %v1025_v47, %v1543_v18  ;;  %v490_v49 = vpop.f32.mrb[9].mxu0 }
 0x15d   : > { %960 = vst [vmem:[%s1551_s16 + $0x10] sm:$0xff] %v932_v46   ;;  %v491_v50 = vadd.f32 %v1543_v18, %v490_v49  ;;  %v1026_v51 = vpop.f32.mrb[10].mxu0  ;;  %1074 = vmatpush3.bf16.msra.mxu1 %v932_v46 }
 0x15e   : > { %v502_v52 = vadd.f32 %v1026_v51, %v1543_v18  ;;  %v493_v53 = vpop.f32.mrb[11].mxu0  ;;  %1075 = vmatprep.subr.bf16.mxu1 %v1341_v16  ;;  %v531_v55 = vmax.f32 %v499_v48, 0.0 }
 0x15f   : > { %v494_v54 = vadd.f32 %v1543_v18, %v493_v53  ;;  %v529_v57 = vmax.f32 %v491_v50, 0.0 }
 0x160   : > { %v532_v56 = vmax.f32 %v502_v52, 0.0 }
 0x161   : > { %v530_v58 = vmax.f32 %v494_v54, 0.0  ;;  %1077 = vmatpush3.bf16.msra.mxu1 %v937_v45 }
 0x162   : > { %v947_v59 = vpack.c.bf16 %v532_v56, %v531_v55  ;;  %1078 = vmatprep.subr.bf16.mxu1 %v1341_v16 }
 0x163   : > { %v942_v60 = vpack.c.bf16 %v530_v58, %v529_v57  ;;  %v1029_v61 = vpop.f32.mrb[12].mxu0 }
 0x164   : > { %963 = vst [vmem:[%s1551_s16 + $0x28] sm:$0xff] %v947_v59   ;;  %v515_v62 = vadd.f32 %v1029_v61, %v1543_v18  ;;  %v506_v63 = vpop.f32.mrb[13].mxu0 }
 0x165   : > { %962 = vst [vmem:[%s1551_s16 + $0x20] sm:$0xff] %v942_v60   ;;  %v507_v0 = vadd.f32 %v1543_v18, %v506_v63  ;;  %v1030_v1 = vpop.f32.mrb[14].mxu0  ;;  %1080 = vmatpush3.bf16.msra.mxu1 %v942_v60 }
 0x166   : > { %v518_v2 = vadd.f32 %v1030_v1, %v1543_v18  ;;  %v509_v3 = vpop.f32.mrb[15].mxu0  ;;  %1081 = vmatprep.subr.bf16.mxu1 %v1341_v16  ;;  %v535_v5 = vmax.f32 %v515_v62, 0.0 }
 0x167   : > { %v510_v4 = vadd.f32 %v1543_v18, %v509_v3  ;;  %v533_v7 = vmax.f32 %v507_v0, 0.0 }
 0x168   : > { %v536_v6 = vmax.f32 %v518_v2, 0.0 }
 0x169   : > { %v534_v8 = vmax.f32 %v510_v4, 0.0  ;;  %1083 = vmatpush3.bf16.msra.mxu1 %v947_v59 }
 0x16a   : > { %v957_v9 = vpack.c.bf16 %v536_v6, %v535_v5  ;;  %1084 = vmatprep.subr.bf16.mxu1 %v1341_v16 }
 0x16b   : > { %v952_v10 = vpack.c.bf16 %v534_v8, %v533_v7 }
 0x16c   : > { %965 = vst [vmem:[%s1551_s16 + $0x38] sm:$0xff] %v957_v9  }
 0x16d   : > { %964 = vst [vmem:[%s1551_s16 + $0x30] sm:$0xff] %v952_v10   ;;  %1086 = vmatpush3.bf16.msra.mxu1 %v952_v10  ;;  %s1239_s16 = scalar_lea.vmem %s1238_s26, 2048 }
 0x16e   : > { %1087 = vmatprep.subr.bf16.mxu1 %v1341_v16  ;;  %p1241_p3 = scmp.lt.s32.totalorder %s1239_s16, %s1233_s7 }
 0x170   : > { %p1242_p7 = por %p1241_p3, %p1240_p13 }
 0x171   : > { %1089 = vmatpush3.bf16.msra.mxu1 %v957_v9 }
 0x172   : > { %p1243_p9 = pnand %p1242_p7, %p1236_p11 }
 0x174   : > { %1064 = vmatmul.mubr.f32.vlgmr.msra.gmra.mrb[0].mxu1 %v617_v11 }
 0x175   : > { %1246 = shalt.err (!%p1243_p9)
}
 0x176   : > { %s1247_s17 = scalar_lea.hbm %s1592_s11, 1024  ;;  %s1251_s15 = scalar_lea.hbm %s1670_s4, 3072 }
 0x177   : > { %p1248_p1 = scmp.ne.s32.totalorder %s1592_s11, %s1247_s17  ;;  %p1252_p10 = scmp.lt.u32.totalorder %s1592_s11, %s1670_s4 }
 0x178   : > { %p1253_p2 = scmp.lt.u32.totalorder %s1251_s15, %s1247_s17  ;;  %p1255_p6 = scmp.lt.u32.totalorder %s1247_s17, %s1592_s11 }
 0x179   : > { %p1249_p0 = pnand %p1248_p1, %p1464_p12 }
 0x17a   : > { %p1254_p4 = por %p1253_p2, %p1252_p10 }
 0x17b   : > { %p1250_p5 = pneg %p1249_p0 }
 0x17c   : > { %p1256_p8 = por %p1255_p6, %p1254_p4 }
 0x17e   : > { %p1257_p11 = pnand %p1256_p8, %p1250_p5 }
 0x180   : > { %1260 = shalt.err (!%p1257_p11)
}
 0x181   : > { %s1345_s27 = smov 64   ;;  %s1346_s10 = smov 4  }
 0x182   : > { %1096 = dma.vmem_to_hbm [thread:$0]  (%p1464_p12), %s1587_s29, 1024, %s1592_s11, %s690_s12, %s1345_s27, %s1345_s27, %s1346_s10  }
 0x183   : > { %s859_s7 = sshll.u32 %s1515_s23, 1  ;;  %s898_s16 = sshll.u32 %s1399_s22, 5 }
 0x184   : > { %s281_s24 = scalar_lea.vmem [#allocation8], %s859_s7  ;;  %s1625_s6 = scalar_lea.hbm %s1671_s5, %s898_s16 }
 0x185   : > { %s724_s26 = sshll.u32 %s281_s24, 4  ;;  %s695_s15 = scalar_lea.sflag [#allocation9], %s1515_s23  ;;  %s1620_s26 = int_to_ptr.vmem [resolvable:$true] %s724_s26 }
 0x186   : > { %s1261_s13 = scalar_lea.vmem %s1620_s26, 32  ;;  %s1347_s22 = smov [#allocation8]  }
 0x187   : > { %p1262_p13 = scmp.ne.s32.totalorder %s1620_s26, %s1261_s13  ;;  %s1265_s29 = sshll.u32 %s1347_s22, 4  ;;  %s1266_s29 = int_to_ptr.vmem [resolvable:$false] %s1265_s29 }
 0x188   : > { %s1267_s11 = scalar_lea.vmem %s1266_s29, 64  ;;  %p1268_p9 = scmp.lt.s32.totalorder %s1620_s26, %s1266_s29 }
 0x189   : > { %p1263_p3 = pnand %p1262_p13, %p1464_p12  ;;  %p1269_p1 = scmp.lt.s32.totalorder %s1267_s11, %s1261_s13 }
 0x18b   : > { %p1264_p7 = pneg %p1263_p3  ;;  %p1270_p0 = por %p1269_p1, %p1268_p9 }
 0x18d   : > { %p1271_p5 = pnand %p1270_p0, %p1264_p7 }
 0x247   : > { %v684_v12 = vpop.f32.mrb[0].mxu1 }
 0x248   : > { %688 = vst [vmem:[%s281_s24] sm:$0x3] %v684_v12  ;;  %v1065_v13 = vpop.f32.mrb[1].mxu1 }
 0x249   : > { %1274 = shalt.err (!%p1271_p5)
}
 0x24a   : > { %s1275_s23 = scalar_lea.hbm %s1625_s6, 32  ;;  %s1279_s27 = scalar_lea.hbm %s1671_s5, 96 }
 0x24b   : > { %p1276_p10 = scmp.ne.s32.totalorder %s1625_s6, %s1275_s23  ;;  %p1280_p6 = scmp.lt.u32.totalorder %s1625_s6, %s1671_s5 }
 0x24c   : > { %p1281_p8 = scmp.lt.u32.totalorder %s1279_s27, %s1275_s23  ;;  %p1283_p13 = scmp.lt.u32.totalorder %s1275_s23, %s1625_s6 }
 0x24d   : > { %p1277_p2 = pnand %p1276_p10, %p1464_p12 }
 0x24e   : > { %p1282_p11 = por %p1281_p8, %p1280_p6 }
 0x24f   : > { %p1278_p4 = pneg %p1277_p2 }
 0x250   : > { %p1284_p3 = por %p1283_p13, %p1282_p11 }
 0x252   : > { %p1285_p7 = pnand %p1284_p3, %p1278_p4 }
 0x254   : > { %1288 = shalt.err (!%p1285_p7)
}
 0x255   : > { %1097 = dma.vmem_to_hbm [thread:$0]  (%p1464_p12), %s1620_s26, 32, %s1625_s6, %s695_s15  }
 0x256 PF: > { %p1118_p9 = scmp.ge.s32.totalorder %s1335_s21, 2  ;;  %s736_s24 = sand.u32 1, %s1323_s18  }
 0x257   : > { %p1686_p1 = scmp.ne.s32.totalorder %s1676_s25, 0  ;;  %s737_s16 = scalar_lea.sflag [#allocation4], %s736_s24 }
 0x259   : > { %p1109_p0 = pnand %p1118_p9, %p1686_p1 }
 0x25b   : > { %1314 = dma.done.wait (!%p1109_p0), %s737_s16, 1024  }
 0x25c   : > { %1316 = vsyncadd (!%p1109_p0), %s737_s16, 4294966272  ;;  %s746_s17 = scalar_lea.sflag [#allocation9], %s736_s24 }
 0x25d   : > { %1318 = dma.done.wait (!%p1109_p0), %s746_s17, 32  }
 0x25e   : > { %1320 = vsyncadd (!%p1109_p0), %s746_s17, 4294967264  ;;  %p23_p12 = scmp.ge.s32.totalorder %s1431_s30, 5   ;;  %s1687_s18 = smov %s1327_s19 }
 0x25f   : > { %s1688_s19 = smov %s1331_s20  ;;  %s1689_s20 = smov %s1460_s8 }
 0x260   : > { %s1690_s21 = smov %s1431_s30  ;;  %25 = sbr.rel (!%p23_p12) target bundleno = 8 (0x8), region = 105 }
 0x267   :  { %751 = vsyncpa [#allocation3], 1 }
 0x268   :  { %753 = vsyncpa [#allocation3 + $0x1], 1 }
 0x269   :  { %754 = vsyncpa [#allocation6], 1 }
 0x26a   :  { %755 = vsyncpa [#allocation4], 1 }
 0x26b   :  { %757 = vsyncpa [#allocation4 + $0x1], 1 }
 0x26c   :  { %758 = vsyncpa [#allocation9], 1 }
 0x26d   :  { %760 = vsyncpa [#allocation9 + $0x1], 1 }

</bundles_post_ra>
